<compile_context>
chip_gen: v7x
topology: tpu7x:2x2x1
jax: 0.10.0
libtpu: 0.0.40
codegen_flags: <defaults>
</compile_context>

<pallas_src>
import functools

import jax
import jax.numpy as jnp
from jax import lax
from jax.experimental import pallas as pl
from jax.experimental.pallas import tpu as pltpu

WINDOW_SIZE = 11
SIGMA = 1.5
FACTOR = 0.06 / 1100.0          # CombinedLoss.__init__ hard-codes this
C1 = 0.01 ** 2
C2 = 0.03 ** 2

_ROW_TILE_CAP = 256             # cap on T*H: bounds block-diag waste / A_bd size
_VMEM_BUDGET = 10 * 1024 * 1024 # conservative working-set budget (fits v7x defaults)
_W_BLOCKDIAG_MAX = 128          # below this width, stack the 5 quantities for the width conv


def _gaussian_1d(window_size=WINDOW_SIZE, sigma=SIGMA):
    x = jnp.arange(window_size, dtype=jnp.float32)
    g = jnp.exp(-((x - window_size // 2) ** 2) / (2.0 * sigma ** 2))
    return g / jnp.sum(g)


def _band_matrix(n, g, window_size=WINDOW_SIZE):
    # M[i, j] = g[j - i + half] (zero outside band) so that (M @ img) equals a
    # zero-padded 'same' 1-D convolution along the row axis.
    half = window_size // 2
    idx = jnp.arange(n)
    d = idx[None, :] - idx[:, None] + half
    valid = (d >= 0) & (d < window_size)
    return jnp.where(valid, g[jnp.clip(d, 0, window_size - 1)], 0.0).astype(jnp.float32)


def _choose_tiling(BC, H, W, itemsize):
    """Pick (T images per grid step, #core splits, steps per split)."""
    divisors = [t for t in range(1, BC + 1) if BC % t == 0]
    row_cap = max(1, _ROW_TILE_CAP // H)

    def shape_ok(t):
        # (8, 128) rule on the (T*H, W) input block: second-minor must be a
        # multiple of 8 unless the block spans the full row extent.
        return (t * H) % 8 == 0 or t == BC

    def vmem_ok(t):
        th = t * H
        w_side = 5 * W if W < _W_BLOCKDIAG_MAX else W
        cost = 4 * (th * th + w_side * w_side)     # resident band matrices
        cost += 4 * 32 * th * W                    # ~32 live f32 temps of (T*H, W)
        cost += 2 * 2 * th * W * itemsize          # double-buffered input tiles
        cost += 2 * 4 * th * W                     # resident accumulator outputs
        return cost <= _VMEM_BUDGET

    valid = [t for t in divisors if t <= row_cap and shape_ok(t) and vmem_ok(t)]
    if not valid:
        valid = [t for t in divisors if shape_ok(t) and vmem_ok(t)]
    if not valid:
        valid = [t for t in divisors if shape_ok(t)] or [BC]
    T = max(valid)
    if BC // T == 1:
        # Prefer >= 2 row blocks so the "parallel" grid axis gives both v7x
        # TensorCores work (near-free on single-core v5e / v6e).
        halves = [t for t in valid if BC // t == 2]
        if halves:
            T = max(halves)
    n_blocks = BC // T
    n_split = 2 if n_blocks % 2 == 0 else 1
    return T, n_split, n_blocks // n_split


def _combined_loss_kernel(x_ref, y_ref, a_ref, b_ref, sse_ref, ssim_ref, *, stack_w):
    step = pl.program_id(1)
    w = x_ref.shape[1]

    img1 = x_ref[...].astype(jnp.float32)          # (T*H, W)
    img2 = y_ref[...].astype(jnp.float32)

    # Five filter inputs stacked along the lane axis -> wide MXU matmuls.
    z = jnp.concatenate(
        [img1, img2, img1 * img1, img2 * img2, img1 * img2], axis=1)   # (T*H, 5W)

    # Height conv: per-image (block-diagonal) gaussian band matrix on the left.
    p = jnp.dot(a_ref[...], z, preferred_element_type=jnp.float32)     # (T*H, 5W)

    # Width conv: gaussian band matrix on the right.
    if stack_w:
        q = jnp.dot(p, b_ref[...], preferred_element_type=jnp.float32)  # (T*H, 5W)
        mu1 = q[:, 0 * w:1 * w]
        mu2 = q[:, 1 * w:2 * w]
        e11 = q[:, 2 * w:3 * w]
        e22 = q[:, 3 * w:4 * w]
        e12 = q[:, 4 * w:5 * w]
    else:
        bt = b_ref[...]                                                  # (W, W)
        mu1 = jnp.dot(p[:, 0 * w:1 * w], bt, preferred_element_type=jnp.float32)
        mu2 = jnp.dot(p[:, 1 * w:2 * w], bt, preferred_element_type=jnp.float32)
        e11 = jnp.dot(p[:, 2 * w:3 * w], bt, preferred_element_type=jnp.float32)
        e22 = jnp.dot(p[:, 3 * w:4 * w], bt, preferred_element_type=jnp.float32)
        e12 = jnp.dot(p[:, 4 * w:5 * w], bt, preferred_element_type=jnp.float32)

    mu1_sq = mu1 * mu1
    mu2_sq = mu2 * mu2
    mu1_mu2 = mu1 * mu2
    sigma1_sq = e11 - mu1_sq
    sigma2_sq = e22 - mu2_sq
    sigma12 = e12 - mu1_mu2

    num = (2.0 * mu1_mu2 + C1) * (2.0 * sigma12 + C2)
    den = (mu1_sq + mu2_sq + C1) * (sigma1_sq + sigma2_sq + C2)
    # Exact reciprocal keeps the 1e-5 check green; approx=True would use the EUP
    # fast path if a looser tolerance is acceptable.
    ssim_map = num * pl.reciprocal(den)

    diff = img1 - img2
    sq_err = diff * diff

    # Elementwise (VPU-only) accumulation into the per-core resident output blocks;
    # the single cross-lane/sublane reduction happens once, outside the kernel.
    @pl.when(step == 0)
    def _init():
        sse_ref[0] = sq_err
        ssim_ref[0] = ssim_map

    @pl.when(step != 0)
    def _accum():
        sse_ref[0] = sse_ref[0] + sq_err
        ssim_ref[0] = ssim_ref[0] + ssim_map


def combined_loss(outputs, targets):
    """factor * mse_loss(outputs, targets) + (1 - ssim(outputs, targets))."""
    B, C, H, W = outputs.shape
    BC = B * C
    n_elems = B * C * H * W

    # Row-stacked images (a free reshape); keep native dtype through the DMA.
    x = outputs.reshape(BC * H, W)
    y = targets.reshape(BC * H, W)

    T, n_split, nb = _choose_tiling(BC, H, W, x.dtype.itemsize)
    TH = T * H
    stack_w = W < _W_BLOCKDIAG_MAX

    g = _gaussian_1d()
    a_img = _band_matrix(H, g)                        # height conv (left multiply)
    bt_img = _band_matrix(W, g).T                     # width conv (right multiply)
    a_bd = jnp.kron(jnp.eye(T, dtype=jnp.float32), a_img)          # (T*H, T*H)
    if stack_w:
        b_mat = jnp.kron(jnp.eye(5, dtype=jnp.float32), bt_img)    # (5W, 5W)
    else:
        b_mat = bt_img                                              # (W, W)

    kernel = functools.partial(_combined_loss_kernel, stack_w=stack_w)

    sse_p, ssim_p = pl.pallas_call(
        kernel,
        out_shape=(jax.ShapeDtypeStruct((n_split, TH, W), jnp.float32),
                   jax.ShapeDtypeStruct((n_split, TH, W), jnp.float32)),
        grid_spec=pltpu.PrefetchScalarGridSpec(
            num_scalar_prefetch=0,
            grid=(n_split, nb),
            in_specs=[
                pl.BlockSpec((TH, W), lambda c, b: (c * nb + b, 0)),
                pl.BlockSpec((TH, W), lambda c, b: (c * nb + b, 0)),
                pl.BlockSpec(tuple(a_bd.shape), lambda c, b: (0, 0)),   # resident
                pl.BlockSpec(tuple(b_mat.shape), lambda c, b: (0, 0)),  # resident
            ],
            out_specs=[
                pl.BlockSpec((1, TH, W), lambda c, b: (c, 0, 0)),
                pl.BlockSpec((1, TH, W), lambda c, b: (c, 0, 0)),
            ],
        ),
        compiler_params=pltpu.CompilerParams(
            dimension_semantics=("parallel", "arbitrary")),
    )(x, y, a_bd, b_mat)

    inv_n = 1.0 / float(n_elems)
    mse = jnp.sum(sse_p) * inv_n
    mssim = jnp.sum(ssim_p) * inv_n
    return FACTOR * mse + (1.0 - mssim)


def combined_loss_ref(outputs, targets):
    """Pure-JAX reference replicating pytorch_ssim.SSIM (window=11, sigma=1.5)."""
    B, C, H, W = outputs.shape
    g = _gaussian_1d()
    w2d = jnp.outer(g, g)
    kern = jnp.broadcast_to(w2d, (C, 1, WINDOW_SIZE, WINDOW_SIZE))
    pad = WINDOW_SIZE // 2

    def filt(z):
        return lax.conv_general_dilated(
            z, kern, (1, 1), padding=[(pad, pad), (pad, pad)],
            feature_group_count=C,
            dimension_numbers=("NCHW", "OIHW", "NCHW"))

    img1 = outputs.astype(jnp.float32)
    img2 = targets.astype(jnp.float32)
    mu1, mu2 = filt(img1), filt(img2)
    mu1_sq, mu2_sq, mu1_mu2 = mu1 * mu1, mu2 * mu2, mu1 * mu2
    sigma1_sq = filt(img1 * img1) - mu1_sq
    sigma2_sq = filt(img2 * img2) - mu2_sq
    sigma12 = filt(img1 * img2) - mu1_mu2
    ssim_map = ((2 * mu1_mu2 + C1) * (2 * sigma12 + C2)) / (
        (mu1_sq + mu2_sq + C1) * (sigma1_sq + sigma2_sq + C2))
    mse = jnp.mean((img1 - img2) ** 2)
    return FACTOR * mse + (1.0 - jnp.mean(ssim_map))


if __name__ == "__main__":
    key = jax.random.PRNGKey(0)
    k1, k2 = jax.random.split(key)
    B, C, H, W = 2, 4, 16, 16
    outputs = jax.random.uniform(k1, (B, C, H, W), dtype=jnp.float32)
    targets = jax.random.uniform(k2, (B, C, H, W), dtype=jnp.float32)

    loss = combined_loss(outputs, targets)
    jax.block_until_ready(loss)

    ref = combined_loss_ref(outputs, targets)
    assert jnp.allclose(loss, ref, atol=1e-5, rtol=1e-5), (float(loss), float(ref))
    print("KERNEL_OK")
</pallas_src>

<mosaic_0001>
module attributes {stable_mosaic.version = 11 : i64} {
  func.func @_combined_loss_kernel(%arg0: i32, %arg1: i32, %arg2: memref<64x16xf32, #tpu.memory_space<vmem>>, %arg3: memref<64x16xf32, #tpu.memory_space<vmem>>, %arg4: memref<64x64xf32, #tpu.memory_space<vmem>>, %arg5: memref<80x80xf32, #tpu.memory_space<vmem>>, %arg6: memref<1x64x16xf32, #tpu.memory_space<vmem>>, %arg7: memref<1x64x16xf32, #tpu.memory_space<vmem>>) attributes {dimension_semantics = [#tpu.dimension_semantics<parallel>, #tpu.dimension_semantics<arbitrary>], iteration_bounds = array<i64: 2, 1>, scalar_prefetch = 0 : i64, scratch_operands = 0 : i64, tpu.core_type = #tpu.core_type<tc>, window_params = [{transform_indices = @transform_0, window_bounds = array<i64: 64, 16>}, {transform_indices = @transform_1, window_bounds = array<i64: 64, 16>}, {pipeline_mode = #tpu.pipeline_mode<synchronous>, transform_indices = @transform_2, window_bounds = array<i64: 64, 64>}, {pipeline_mode = #tpu.pipeline_mode<synchronous>, transform_indices = @transform_3, window_bounds = array<i64: 80, 80>}, {transform_indices = @transform_4, window_bounds = array<i64: 1, 64, 16>}, {transform_indices = @transform_5, window_bounds = array<i64: 1, 64, 16>}]} {
    %c0 = arith.constant 0 : index
    %c0_0 = arith.constant 0 : index
    %0 = vector.load %arg2[%c0, %c0_0] : memref<64x16xf32, #tpu.memory_space<vmem>>, vector<64x16xf32>
    %c0_1 = arith.constant 0 : index
    %c0_2 = arith.constant 0 : index
    %1 = vector.load %arg3[%c0_1, %c0_2] : memref<64x16xf32, #tpu.memory_space<vmem>>, vector<64x16xf32>
    %2 = arith.mulf %0, %0 : vector<64x16xf32>
    %3 = arith.mulf %1, %1 : vector<64x16xf32>
    %4 = arith.mulf %0, %1 : vector<64x16xf32>
    %5 = tpu.concatenate %0, %1, %2, %3, %4 in 1 : vector<64x16xf32>, vector<64x16xf32>, vector<64x16xf32>, vector<64x16xf32>, vector<64x16xf32> -> vector<64x80xf32>
    %c0_3 = arith.constant 0 : index
    %c0_4 = arith.constant 0 : index
    %6 = vector.load %arg4[%c0_3, %c0_4] : memref<64x64xf32, #tpu.memory_space<vmem>>, vector<64x64xf32>
    %cst = arith.constant dense<0.000000e+00> : vector<64x80xf32>
    %7 = tpu.matmul %6, %5, %cst {dimension_numbers = #tpu.dot_dimension_numbers<[1], [0], [0], [1], [0, 0, 1, 1], [], []>} : vector<64x64xf32>, vector<64x80xf32>, vector<64x80xf32> -> vector<64x80xf32>
    %c0_5 = arith.constant 0 : index
    %c0_6 = arith.constant 0 : index
    %8 = vector.load %arg5[%c0_5, %c0_6] : memref<80x80xf32, #tpu.memory_space<vmem>>, vector<80x80xf32>
    %cst_7 = arith.constant dense<0.000000e+00> : vector<64x80xf32>
    %9 = tpu.matmul %7, %8, %cst_7 {dimension_numbers = #tpu.dot_dimension_numbers<[1], [0], [0], [1], [0, 0, 1, 1], [], []>} : vector<64x80xf32>, vector<80x80xf32>, vector<64x80xf32> -> vector<64x80xf32>
    %10 = vector.extract_strided_slice %9 {offsets = [0, 0], sizes = [64, 16], strides = [1, 1]} : vector<64x80xf32> to vector<64x16xf32>
    %11 = vector.extract_strided_slice %9 {offsets = [0, 16], sizes = [64, 16], strides = [1, 1]} : vector<64x80xf32> to vector<64x16xf32>
    %12 = vector.extract_strided_slice %9 {offsets = [0, 32], sizes = [64, 16], strides = [1, 1]} : vector<64x80xf32> to vector<64x16xf32>
    %13 = vector.extract_strided_slice %9 {offsets = [0, 48], sizes = [64, 16], strides = [1, 1]} : vector<64x80xf32> to vector<64x16xf32>
    %14 = vector.extract_strided_slice %9 {offsets = [0, 64], sizes = [64, 16], strides = [1, 1]} : vector<64x80xf32> to vector<64x16xf32>
    %15 = arith.mulf %10, %10 : vector<64x16xf32>
    %16 = arith.mulf %11, %11 : vector<64x16xf32>
    %17 = arith.mulf %10, %11 : vector<64x16xf32>
    %18 = arith.subf %12, %15 : vector<64x16xf32>
    %19 = arith.subf %13, %16 : vector<64x16xf32>
    %20 = arith.subf %14, %17 : vector<64x16xf32>
    %cst_8 = arith.constant 2.000000e+00 : f32
    %21 = vector.broadcast %cst_8 : f32 to vector<64x16xf32>
    %22 = arith.mulf %21, %17 : vector<64x16xf32>
    %cst_9 = arith.constant 9.99999974E-5 : f32
    %23 = vector.broadcast %cst_9 : f32 to vector<64x16xf32>
    %24 = arith.addf %22, %23 : vector<64x16xf32>
    %cst_10 = arith.constant 2.000000e+00 : f32
    %25 = vector.broadcast %cst_10 : f32 to vector<64x16xf32>
    %26 = arith.mulf %25, %20 : vector<64x16xf32>
    %cst_11 = arith.constant 8.99999984E-4 : f32
    %27 = vector.broadcast %cst_11 : f32 to vector<64x16xf32>
    %28 = arith.addf %26, %27 : vector<64x16xf32>
    %29 = arith.mulf %24, %28 : vector<64x16xf32>
    %30 = arith.addf %15, %16 : vector<64x16xf32>
    %cst_12 = arith.constant 9.99999974E-5 : f32
    %31 = vector.broadcast %cst_12 : f32 to vector<64x16xf32>
    %32 = arith.addf %30, %31 : vector<64x16xf32>
    %33 = arith.addf %18, %19 : vector<64x16xf32>
    %cst_13 = arith.constant 8.99999984E-4 : f32
    %34 = vector.broadcast %cst_13 : f32 to vector<64x16xf32>
    %35 = arith.addf %33, %34 : vector<64x16xf32>
    %36 = arith.mulf %32, %35 : vector<64x16xf32>
    %37 = tpu.reciprocal %36 : vector<64x16xf32> -> vector<64x16xf32>
    %38 = arith.mulf %29, %37 : vector<64x16xf32>
    %39 = arith.subf %0, %1 : vector<64x16xf32>
    %40 = arith.mulf %39, %39 : vector<64x16xf32>
    %c0_i32 = arith.constant 0 : i32
    %41 = arith.cmpi eq, %arg1, %c0_i32 : i32
    %42 = arith.extui %41 : i1 to i32
    %c0_i32_14 = arith.constant 0 : i32
    %43 = arith.cmpi ne, %42, %c0_i32_14 : i32
    scf.if %43 {
      %c0_17 = arith.constant 0 : index
      %c0_18 = arith.constant 0 : index
      %c0_19 = arith.constant 0 : index
      %47 = vector.load %arg6[%c0_17, %c0_18, %c0_19] : memref<1x64x16xf32, #tpu.memory_space<vmem>>, vector<1x64x16xf32>
      %48 = vector.shape_cast %47 : vector<1x64x16xf32> to vector<64x16xf32>
      %49 = vector.shape_cast %40 : vector<64x16xf32> to vector<1x64x16xf32>
      tpu.vector_store %arg6[%c0_17, %c0_18, %c0_19], %49 {strides = array<i32>} : memref<1x64x16xf32, #tpu.memory_space<vmem>>, vector<1x64x16xf32>,
      %c0_20 = arith.constant 0 : index
      %c0_21 = arith.constant 0 : index
      %c0_22 = arith.constant 0 : index
      %50 = vector.load %arg7[%c0_20, %c0_21, %c0_22] : memref<1x64x16xf32, #tpu.memory_space<vmem>>, vector<1x64x16xf32>
      %51 = vector.shape_cast %50 : vector<1x64x16xf32> to vector<64x16xf32>
      %52 = vector.shape_cast %38 : vector<64x16xf32> to vector<1x64x16xf32>
      tpu.vector_store %arg7[%c0_20, %c0_21, %c0_22], %52 {strides = array<i32>} : memref<1x64x16xf32, #tpu.memory_space<vmem>>, vector<1x64x16xf32>,
    } else {
    }
    %c0_i32_15 = arith.constant 0 : i32
    %44 = arith.cmpi ne, %arg1, %c0_i32_15 : i32
    %45 = arith.extui %44 : i1 to i32
    %c0_i32_16 = arith.constant 0 : i32
    %46 = arith.cmpi ne, %45, %c0_i32_16 : i32
    scf.if %46 {
      %c0_17 = arith.constant 0 : index
      %c0_18 = arith.constant 0 : index
      %c0_19 = arith.constant 0 : index
      %47 = vector.load %arg6[%c0_17, %c0_18, %c0_19] : memref<1x64x16xf32, #tpu.memory_space<vmem>>, vector<1x64x16xf32>
      %48 = vector.shape_cast %47 : vector<1x64x16xf32> to vector<64x16xf32>
      %49 = arith.addf %48, %40 : vector<64x16xf32>
      %c0_20 = arith.constant 0 : index
      %c0_21 = arith.constant 0 : index
      %c0_22 = arith.constant 0 : index
      %50 = vector.load %arg6[%c0_20, %c0_21, %c0_22] : memref<1x64x16xf32, #tpu.memory_space<vmem>>, vector<1x64x16xf32>
      %51 = vector.shape_cast %50 : vector<1x64x16xf32> to vector<64x16xf32>
      %52 = vector.shape_cast %49 : vector<64x16xf32> to vector<1x64x16xf32>
      tpu.vector_store %arg6[%c0_20, %c0_21, %c0_22], %52 {strides = array<i32>} : memref<1x64x16xf32, #tpu.memory_space<vmem>>, vector<1x64x16xf32>,
      %c0_23 = arith.constant 0 : index
      %c0_24 = arith.constant 0 : index
      %c0_25 = arith.constant 0 : index
      %53 = vector.load %arg7[%c0_23, %c0_24, %c0_25] : memref<1x64x16xf32, #tpu.memory_space<vmem>>, vector<1x64x16xf32>
      %54 = vector.shape_cast %53 : vector<1x64x16xf32> to vector<64x16xf32>
      %55 = arith.addf %54, %38 : vector<64x16xf32>
      %c0_26 = arith.constant 0 : index
      %c0_27 = arith.constant 0 : index
      %c0_28 = arith.constant 0 : index
      %56 = vector.load %arg7[%c0_26, %c0_27, %c0_28] : memref<1x64x16xf32, #tpu.memory_space<vmem>>, vector<1x64x16xf32>
      %57 = vector.shape_cast %56 : vector<1x64x16xf32> to vector<64x16xf32>
      %58 = vector.shape_cast %55 : vector<64x16xf32> to vector<1x64x16xf32>
      tpu.vector_store %arg7[%c0_26, %c0_27, %c0_28], %58 {strides = array<i32>} : memref<1x64x16xf32, #tpu.memory_space<vmem>>, vector<1x64x16xf32>,
    } else {
    }
    return
  }
  func.func @transform_0(%arg0: i32, %arg1: i32) -> (i32, i32) {
    %c1_i32 = arith.constant 1 : i32
    %0 = arith.muli %arg0, %c1_i32 : i32
    %1 = arith.addi %0, %arg1 : i32
    %c0_i32 = arith.constant 0 : i32
    %c0_i32_0 = arith.constant 0 : i32
    return %1, %c0_i32 : i32, i32
  }
  func.func @transform_1(%arg0: i32, %arg1: i32) -> (i32, i32) {
    %c1_i32 = arith.constant 1 : i32
    %0 = arith.muli %arg0, %c1_i32 : i32
    %1 = arith.addi %0, %arg1 : i32
    %c0_i32 = arith.constant 0 : i32
    %c0_i32_0 = arith.constant 0 : i32
    return %1, %c0_i32 : i32, i32
  }
  func.func @transform_2(%arg0: i32, %arg1: i32) -> (i32, i32) {
    %c0_i32 = arith.constant 0 : i32
    %c0_i32_0 = arith.constant 0 : i32
    %c0_i32_1 = arith.constant 0 : i32
    return %c0_i32, %c0_i32_0 : i32, i32
  }
  func.func @transform_3(%arg0: i32, %arg1: i32) -> (i32, i32) {
    %c0_i32 = arith.constant 0 : i32
    %c0_i32_0 = arith.constant 0 : i32
    %c0_i32_1 = arith.constant 0 : i32
    return %c0_i32, %c0_i32_0 : i32, i32
  }
  func.func @transform_4(%arg0: i32, %arg1: i32) -> (i32, i32, i32) {
    %c0_i32 = arith.constant 0 : i32
    %c0_i32_0 = arith.constant 0 : i32
    %c0_i32_1 = arith.constant 0 : i32
    return %arg0, %c0_i32, %c0_i32_0 : i32, i32, i32
  }
  func.func @transform_5(%arg0: i32, %arg1: i32) -> (i32, i32, i32) {
    %c0_i32 = arith.constant 0 : i32
    %c0_i32_0 = arith.constant 0 : i32
    %c0_i32_1 = arith.constant 0 : i32
    return %arg0, %c0_i32, %c0_i32_0 : i32, i32, i32
  }
}

</mosaic_0001>

<bundles_post_ra>
// kernel: tpu_custom_call.1
= control target key start
LH: loop header
LB: loop body
LE: loop exit
PB: predicated region body
PF: predicated region fallthrough
CT: control target
= control target key end

     0   :  { %s1658_s18 = smov 0   ;;  %s1660_s19 = smov 0   ;;  %s2142_s0 = inlined_call_operand.vmem [shape: f32[128,16], index: 0, kind: input, shape index: {}]   ;;  %s2143_s1 = inlined_call_operand.vmem [shape: f32[128,16], index: 1, kind: input, shape index: {}]   ;;  %s2144_s2 = inlined_call_operand.vmem [shape: f32[64,64], index: 2, kind: input, shape index: {}]   ;;  %s2145_s3 = inlined_call_operand.vmem [shape: f32[80,80], index: 3, kind: input, shape index: {}]   ;;  %s2146_s4 = inlined_call_operand.vmem [shape: f32[2,64,16], index: 4, kind: output, shape index: {0}]   ;;  %s2147_s5 = inlined_call_operand.vmem [shape: f32[2,64,16], index: 5, kind: output, shape index: {1}]  }
   0x1   :  { %s1662_s20 = smov 0  }
   0x2 LB: > { %s28_s21 = sadd.s32 1, %s1616_s19  ;;  %p1313_p0 = scmp.ge.s32.totalorder %s1620_s20, 1  ;;  %s1620_s20 = sphi %s1662_s20, %s16_s20   ;;  %s1616_s19 = sphi %s1660_s19, %s2149_s19   ;;  %s1612_s18 = sphi %s1658_s18, %s2148_s18  }
   0x3   : > { %p30_p1 = scmp.ge.s32.totalorder %s28_s21, 2  ;;  %p222_p2 = scmp.lt.s32.totalorder %s1620_s20, 3 }
   0x5   : > { %s2151_s21 = smov (%p30_p1, %s28_s21), 0  ;;  %p223_p3 = pnand %p1313_p0, %p222_p2 }
   0x6   : > { %s1314_s22 = sshll.u32 (!%p223_p3), %s1612_s18, 3  ;;  %p278_p4 = scmp.lt.s32.totalorder (!%p223_p3), %s1612_s18, 1  ;;  %vm456_vm0 = vcmask (!%p223_p3), 130048   ;;  %vm483_vm1 = vcmask (!%p223_p3), 523264   ;;  %vm465_vm2 = vcmask (!%p223_p3), 261120   ;;  %vm474_vm3 = vcmask (!%p223_p3), 392192  }
   0x7   : > { %226 = sbr.rel (%p223_p3) target bundleno = 989 (0x3dd), region = 36  ;;  %p264_p5 = scmp.lt.s32.totalorder (!%p223_p3), %s1314_s22, 15  ;;  %vm639_vm4 = vcmask (!%p223_p3), 654336  }
   0x8   : > { %s1622_s9 = smov (!%p223_p3), 16   ;;  %s1623_s10 = smov (!%p223_p3), 48  }
   0x9   : > { %s1624_s11 = smov (!%p223_p3), 64   ;;  %s1625_s12 = smov (!%p223_p3), 32  }
   0xa   : > { %s1626_s13 = smov (!%p223_p3), 112  }
   0xe   : > { %s2153_s22 = smov (!%p264_p5, %s1314_s22), 15  ;;  %s2155_s18 = smov (!%p278_p4, %s1612_s18), 1 }
   0xf   : > { %s1315_s23 = sshll.u32 %s2153_s22, 3  ;;  %s1340_s30 = sshll.u32 %s2155_s18, 6 }
  0x10   : > { %s1681_s26 = scalar_lea.vmem %s2143_s1, %s1315_s23  ;;  %s1686_s29 = scalar_lea.vmem %s2142_s0, %s1315_s23 }
  0x11   : > { %v296_v0 = vld [vmem:[%s1681_s26] sm:$0xff]  ;;  %v297_v1 = vld [vmem:[%s1681_s26 + $0x8] sm:$0xff]  ;;  %v298_v8 = vld [vmem:[%s1681_s26 + $0x10] sm:$0xff]  ;;  %s1705_s8 = scalar_lea.vmem %s2146_s4, %s1340_s30  ;;  %s2109_s15 = scalar_lea.vmem %s2147_s5, %s1340_s30 }
  0x12   : > { %v1691_v2 = vld [vmem:[%s1686_s29] sm:$0xff]  ;;  %v1502_v3 = vpack.i.bf16 %v297_v1, %v296_v0  ;;  %v1695_v4 = vld [vmem:[%s1686_s29 + $0x8] sm:$0xff]  ;;  %v312_v6 = vmul.f32 %v296_v0, %v296_v0  ;;  %v313_v7 = vmul.f32 %v297_v1, %v297_v1  ;;  %v299_v9 = vld [vmem:[%s1681_s26 + $0x18] sm:$0xff]  ;;  %v314_v29 = vmul.f32 %v298_v8, %v298_v8 }
  0x13   : > { %v1113_v5 = vsub.f32 %v1691_v2, %v296_v0  ;;  %v1114_v10 = vsub.f32 %v1695_v4, %v297_v1  ;;  %v1507_v11 = vpack.i.bf16 %v299_v9, %v298_v8  ;;  %v320_v12 = vmul.f32 %v296_v0, %v1691_v2  ;;  %v1711_v14 = vld [vmem:[%s1686_s29 + $0x10] sm:$0xff]  ;;  %v1714_v15 = vld [vmem:[%s1686_s29 + $0x18] sm:$0xff]  ;;  %v300_v31 = vld [vmem:[%s1681_s26 + $0x20] sm:$0xff] }
  0x14   : > { %v321_v13 = vmul.f32 %v297_v1, %v1695_v4  ;;  %1503 = vrot.lane.b32.xlu0 %v1502_v3, %s1622_s9  ;;  %v1517_v17 = vpack.i.bf16 %v313_v7, %v312_v6  ;;  %v304_v18 = vmul.f32 %v1691_v2, %v1691_v2  ;;  %v305_v19 = vmul.f32 %v1695_v4, %v1695_v4  ;;  %v1735_v32 = vld [vmem:[%s1686_s29 + $0x20] sm:$0xff]  ;;  %v301_v33 = vld [vmem:[%s1681_s26 + $0x28] sm:$0xff]  ;;  %v302_v41 = vld [vmem:[%s1681_s26 + $0x30] sm:$0xff] }
  0x15   : > { %v1121_v16 = vmul.f32 %v1113_v5, %v1113_v5  ;;  %v1122_v20 = vmul.f32 %v1114_v10, %v1114_v10  ;;  %v306_v22 = vmul.f32 %v1711_v14, %v1711_v14  ;;  %v307_v23 = vmul.f32 %v1714_v15, %v1714_v15  ;;  %v1739_v34 = vld [vmem:[%s1686_s29 + $0x28] sm:$0xff]  ;;  %v303_v44 = vld [vmem:[%s1681_s26 + $0x38] sm:$0xff]  ;;  %v1754_v45 = vld [vmem:[%s1686_s29 + $0x30] sm:$0xff] }
  0x16   : > { %v1522_v21 = vpack.i.bf16 %v321_v13, %v320_v12  ;;  %1518 = vrot.lane.b32.xlu1 %v1517_v17, %s1623_s10  ;;  %v1115_v24 = vsub.f32 %v1711_v14, %v298_v8  ;;  %v1116_v25 = vsub.f32 %v1714_v15, %v299_v9  ;;  %v1512_v26 = vpack.i.bf16 %v305_v19, %v304_v18  ;;  %v1757_v46 = vld [vmem:[%s1686_s29 + $0x38] sm:$0xff]  ;;  %v630_v12 = vld [vmem:[%s2145_s3 + $0x8] sm:$0xff]  ;;  %v631_v13 = vld [vmem:[%s2145_s3 + $0x10] sm:$0xff] }
  0x17   : > { %1133 = vst.msk [vmem:[%s1705_s8] sm:$0xff] %vm456_vm0, %v1121_v16  ;;  %1134 = vst.msk [vmem:[%s1705_s8 + $0x8] sm:$0xff] %vm456_vm0, %v1122_v20  ;;  %v315_v30 = vmul.f32 %v299_v9, %v299_v9  ;;  %v1117_v35 = vsub.f32 %v1735_v32, %v300_v31  ;;  %v1527_v36 = vpack.i.bf16 %v307_v23, %v306_v22  ;;  %v632_v17 = vld [vmem:[%s2145_s3 + $0x18] sm:$0xff]  ;;  %v633_v19 = vld [vmem:[%s2145_s3 + $0x20] sm:$0xff] }
  0x18   : > { %1508 = vrot.lane.b32.xlu0 %v1507_v11, %s1622_s9  ;;  %v1123_v27 = vmul.f32 %v1115_v24, %v1115_v24  ;;  %v1124_v28 = vmul.f32 %v1116_v25, %v1116_v25  ;;  %v322_v37 = vmul.f32 %v298_v8, %v1711_v14  ;;  %v323_v38 = vmul.f32 %v299_v9, %v1714_v15  ;;  %v492_v8 = vld [vmem:[%s2144_s2] sm:$0xff]  ;;  %v634_v20 = vld [vmem:[%s2145_s3 + $0x28] sm:$0xff]  ;;  %v635_v22 = vld [vmem:[%s2145_s3 + $0x30] sm:$0xff] }
  0x19   : > { %v1118_v39 = vsub.f32 %v1739_v34, %v301_v33  ;;  %v1125_v40 = vmul.f32 %v1117_v35, %v1117_v35  ;;  %v1532_v42 = vpack.i.bf16 %v315_v30, %v314_v29  ;;  %v1119_v47 = vsub.f32 %v1754_v45, %v302_v41  ;;  %1392 = vmatprep.mubr.msk.f32.mxu0 %vm483_vm1, %v492_v8  ;;  %v629_v11 = vld [vmem:[%s2145_s3] sm:$0xff]  ;;  %v636_v23 = vld [vmem:[%s2145_s3 + $0x38] sm:$0xff] }
  0x1a   : > { %1523 = vrot.lane.b32.xlu1 %v1522_v21, %s1624_s11  ;;  %1135 = vst.msk [vmem:[%s1705_s8 + $0x10] sm:$0xff] %vm456_vm0, %v1123_v27  ;;  %1136 = vst.msk [vmem:[%s1705_s8 + $0x18] sm:$0xff] %vm456_vm0, %v1124_v28  ;;  %v1120_v48 = vsub.f32 %v1757_v46, %v303_v44  ;;  %v1537_v49 = vpack.i.bf16 %v323_v38, %v322_v37  ;;  %v308_v50 = vmul.f32 %v1735_v32, %v1735_v32  ;;  %v637_v25 = vld [vmem:[%s2145_s3 + $0x40] sm:$0xff] }
  0x1b   : > { %v1126_v43 = vmul.f32 %v1118_v39, %v1118_v39  ;;  %1137 = vst.msk [vmem:[%s1705_s8 + $0x20] sm:$0xff] %vm456_vm0, %v1125_v40  ;;  %v309_v51 = vmul.f32 %v1739_v34, %v1739_v34  ;;  %v1127_v52 = vmul.f32 %v1119_v47, %v1119_v47  ;;  %v1542_v54 = vpack.i.bf16 %v301_v33, %v300_v31 }
  0x1c   : > { %1513 = vrot.lane.b32.xlu0 %v1512_v26, %s1625_s12  ;;  %v1128_v53 = vmul.f32 %v1120_v48, %v1120_v48  ;;  %v316_v55 = vmul.f32 %v300_v31, %v300_v31  ;;  %v317_v56 = vmul.f32 %v301_v33, %v301_v33  ;;  %v324_v58 = vmul.f32 %v300_v31, %v1735_v32  ;;  %v638_v26 = vld [vmem:[%s2145_s3 + $0x48] sm:$0xff] }
  0x1d   : > { %1138 = vst.msk [vmem:[%s1705_s8 + $0x28] sm:$0xff] %vm456_vm0, %v1126_v43  ;;  %1139 = vst.msk [vmem:[%s1705_s8 + $0x30] sm:$0xff] %vm456_vm0, %v1127_v52  ;;  %v1547_v57 = vpack.i.bf16 %v309_v51, %v308_v50  ;;  %v325_v59 = vmul.f32 %v301_v33, %v1739_v34  ;;  %v310_v62 = vmul.f32 %v1754_v45, %v1754_v45 }
  0x1e   : > { %1528 = vrot.lane.b32.xlu1 %v1527_v36, %s1625_s12  ;;  %1140 = vst.msk [vmem:[%s1705_s8 + $0x38] sm:$0xff] %vm456_vm0, %v1128_v53  ;;  %v1552_v60 = vpack.i.bf16 %v317_v56, %v316_v55  ;;  %v311_v63 = vmul.f32 %v1757_v46, %v1757_v46  ;;  %v1562_v0 = vpack.i.bf16 %v303_v44, %v302_v41 }
  0x1f   : > { %v1557_v61 = vpack.i.bf16 %v325_v59, %v324_v58  ;;  %v318_v1 = vmul.f32 %v302_v41, %v302_v41  ;;  %v319_v3 = vmul.f32 %v303_v44, %v303_v44  ;;  %v326_v6 = vmul.f32 %v302_v41, %v1754_v45 }
  0x20   : > { %1533 = vrot.lane.b32.xlu0 %v1532_v42, %s1623_s10  ;;  %v1567_v5 = vpack.i.bf16 %v311_v63, %v310_v62  ;;  %v327_v7 = vmul.f32 %v303_v44, %v1757_v46  ;;  %v1452_v16 = vpack.c.bf16 %v630_v12, %v629_v11  ;;  %v1456_v18 = vpack.c.bf16 %v632_v17, %v631_v13 }
  0x21   : > { %v1572_v9 = vpack.i.bf16 %v319_v3, %v318_v1  ;;  %v1460_v21 = vpack.c.bf16 %v634_v20, %v633_v19  ;;  %v1464_v24 = vpack.c.bf16 %v636_v23, %v635_v22  ;;  %v1468_v27 = vpack.c.bf16 %v638_v26, %v637_v25 }
  0x22   : > { %1538 = vrot.lane.b32.xlu1 %v1537_v49, %s1624_s11  ;;  %v1577_v10 = vpack.i.bf16 %v327_v7, %v326_v6  ;;  %1453 = vmatprep.subr.bf16.mxu1 %v1452_v16 }
  0x23   : > { %1455 = vmatpush3.bf16.msra.mxu1 %v1452_v16 }
  0x24   : > { %1543 = vrot.lane.b32.xlu0 %v1542_v54, %s1622_s9  ;;  %1457 = vmatprep.subr.bf16.mxu1 %v1456_v18 }
  0x26   : > { %1548 = vrot.lane.b32.xlu1 %v1547_v57, %s1625_s12 }
  0x27   : > { %1459 = vmatpush3.bf16.msra.mxu1 %v1456_v18 }
  0x28   : > { %1553 = vrot.lane.b32.xlu0 %v1552_v60, %s1623_s10  ;;  %1461 = vmatprep.subr.bf16.mxu1 %v1460_v21 }
  0x2a   : > { %1558 = vrot.lane.b32.xlu1 %v1557_v61, %s1624_s11 }
  0x2b   : > { %1463 = vmatpush3.bf16.msra.mxu1 %v1460_v21 }
  0x2c   : > { %1563 = vrot.lane.b32.xlu0 %v1562_v0, %s1622_s9  ;;  %1465 = vmatprep.subr.bf16.mxu1 %v1464_v24 }
  0x2e   : > { %1568 = vrot.lane.b32.xlu1 %v1567_v5, %s1625_s12 }
  0x2f   : > { %1467 = vmatpush3.bf16.msra.mxu1 %v1464_v24 }
  0x30   : > { %1573 = vrot.lane.b32.xlu0 %v1572_v9, %s1623_s10  ;;  %1469 = vmatprep.subr.bf16.mxu1 %v1468_v27 }
  0x32   : > { %1578 = vrot.lane.b32.xlu1 %v1577_v10, %s1624_s11 }
  0x33   : > { %1471 = vmatpush3.bf16.msra.mxu1 %v1468_v27 }
  0x86   : > { %v1504_v28 = vpop.permute.xlu0 %1503 }
  0x87   : > { %v1506_v31 = vunpack.i.h.bf16 %v1504_v28  ;;  %v1505_v33 = vunpack.i.l.bf16 %v1504_v28 }
  0x88   : > { %v1519_v29 = vpop.permute.xlu1 %1518 }
  0x89   : > { %v457_v39 = vsel %vm456_vm0, %v1691_v2, %v1505_v33  ;;  %v458_v40 = vsel %vm456_vm0, %v1695_v4, %v1506_v31  ;;  %v1521_v43 = vunpack.i.h.bf16 %v1519_v29  ;;  %v1520_v44 = vunpack.i.l.bf16 %v1519_v29 }
  0x8a   : > { %v1509_v30 = vpop.permute.xlu0 %1508 }
  0x8b   : > { %v1511_v35 = vunpack.i.h.bf16 %v1509_v30  ;;  %v1510_v36 = vunpack.i.l.bf16 %v1509_v30 }
  0x8c   : > { %v1524_v37 = vpop.permute.xlu1 %1523 }
  0x8d   : > { %v459_v47 = vsel %vm456_vm0, %v1711_v14, %v1510_v36  ;;  %v460_v48 = vsel %vm456_vm0, %v1714_v15, %v1511_v35  ;;  %v1526_v53 = vunpack.i.h.bf16 %v1524_v37  ;;  %v1525_v54 = vunpack.i.l.bf16 %v1524_v37 }
  0x8e   : > { %v1514_v38 = vpop.permute.xlu0 %1513 }
  0x8f   : > { %v1516_v41 = vunpack.i.h.bf16 %v1514_v38  ;;  %v1515_v42 = vunpack.i.l.bf16 %v1514_v38 }
  0x90   : > { %v1529_v49 = vpop.permute.xlu1 %1528 }
  0x91   : > { %v467_v50 = vsel %vm465_vm2, %v458_v40, %v1516_v41  ;;  %v466_v51 = vsel %vm465_vm2, %v457_v39, %v1515_v42  ;;  %v1531_v52 = vunpack.i.h.bf16 %v1529_v49  ;;  %v1530_v2 = vunpack.i.l.bf16 %v1529_v49 }
  0x92   : > { %v1534_v4 = vpop.permute.xlu0 %1533  ;;  %v475_v55 = vsel %vm474_vm3, %v466_v51, %v1520_v44  ;;  %v476_v56 = vsel %vm474_vm3, %v467_v50, %v1521_v43 }
  0x93   : > { %v469_v57 = vsel %vm465_vm2, %v460_v48, %v1531_v52  ;;  %v468_v14 = vsel %vm465_vm2, %v459_v47, %v1530_v2  ;;  %v1536_v58 = vunpack.i.h.bf16 %v1534_v4  ;;  %v1535_v15 = vunpack.i.l.bf16 %v1534_v4  ;;  %v493_v52 = vld [vmem:[%s2144_s2 + $0x8] sm:$0xff]  ;;  %v494_v2 = vld [vmem:[%s2144_s2 + $0x10] sm:$0xff] }
  0x94   : > { %v1539_v59 = vpop.permute.xlu1 %1538  ;;  %v484_v60 = vsel %vm483_vm1, %v475_v55, %v1525_v54  ;;  %v485_v61 = vsel %vm483_vm1, %v476_v56, %v1526_v53  ;;  %v495_v53 = vld [vmem:[%s2144_s2 + $0x18] sm:$0xff]  ;;  %v496_v54 = vld [vmem:[%s2144_s2 + $0x20] sm:$0xff]  ;;  %v497_v4 = vld [vmem:[%s2144_s2 + $0x28] sm:$0xff] }
  0x95   : > { %v478_v62 = vsel %vm474_vm3, %v469_v57, %v1536_v58  ;;  %v477_v63 = vsel %vm474_vm3, %v468_v14, %v1535_v15  ;;  %v1541_v0 = vunpack.i.h.bf16 %v1539_v59  ;;  %v1540_v1 = vunpack.i.l.bf16 %v1539_v59  ;;  %v498_v55 = vld [vmem:[%s2144_s2 + $0x30] sm:$0xff]  ;;  %v499_v56 = vld [vmem:[%s2144_s2 + $0x38] sm:$0xff] }
  0x96   : > { %v1544_v3 = vpop.permute.xlu0 %1543  ;;  %v1436_v5 = vpack.c.bf16 %v485_v61, %v484_v60 }
  0x97   : > { %v1546_v6 = vunpack.i.h.bf16 %v1544_v3  ;;  %v1545_v7 = vunpack.i.l.bf16 %v1544_v3  ;;  %v486_v8 = vsel %vm483_vm1, %v477_v63, %v1540_v1  ;;  %v487_v9 = vsel %vm483_vm1, %v478_v62, %v1541_v0 }
  0x98   : > { %1437 = vmatprep.subr.bf16.mxu0 %v1436_v5  ;;  %v1549_v10 = vpop.permute.xlu1 %1548  ;;  %v1440_v11 = vpack.c.bf16 %v487_v9, %v486_v8 }
  0x99   : > { %v462_v12 = vsel %vm456_vm0, %v1739_v34, %v1546_v6  ;;  %v461_v13 = vsel %vm456_vm0, %v1735_v32, %v1545_v7  ;;  %1439 = vmatpush3.bf16.msra.mxu0 %v1436_v5  ;;  %v1551_v16 = vunpack.i.h.bf16 %v1549_v10  ;;  %v1550_v17 = vunpack.i.l.bf16 %v1549_v10 }
  0x9a   : > { %v1554_v18 = vpop.permute.xlu0 %1553  ;;  %1441 = vmatprep.subr.bf16.mxu0 %v1440_v11 }
  0x9b   : > { %v470_v19 = vsel %vm465_vm2, %v461_v13, %v1550_v17  ;;  %v471_v20 = vsel %vm465_vm2, %v462_v12, %v1551_v16  ;;  %v1556_v21 = vunpack.i.h.bf16 %v1554_v18  ;;  %v1555_v22 = vunpack.i.l.bf16 %v1554_v18 }
  0x9c   : > { %v1559_v23 = vpop.permute.xlu1 %1558 }
  0x9d   : > { %v479_v24 = vsel %vm474_vm3, %v470_v19, %v1555_v22  ;;  %v480_v25 = vsel %vm474_vm3, %v471_v20, %v1556_v21  ;;  %1443 = vmatpush3.bf16.msra.mxu0 %v1440_v11  ;;  %v1561_v34 = vunpack.i.h.bf16 %v1559_v23  ;;  %v1560_v26 = vunpack.i.l.bf16 %v1559_v23 }
  0x9e   : > { %v1564_v32 = vpop.permute.xlu0 %1563 }
  0x9f   : > { %v1566_v27 = vunpack.i.h.bf16 %v1564_v32  ;;  %v1565_v28 = vunpack.i.l.bf16 %v1564_v32  ;;  %v488_v29 = vsel %vm483_vm1, %v479_v24, %v1560_v26  ;;  %v489_v30 = vsel %vm483_vm1, %v480_v25, %v1561_v34 }
  0xa0   : > { %v1569_v31 = vpop.permute.xlu1 %1568  ;;  %v1444_v33 = vpack.c.bf16 %v489_v30, %v488_v29 }
  0xa1   : > { %v464_v35 = vsel %vm456_vm0, %v1757_v46, %v1566_v27  ;;  %v463_v36 = vsel %vm456_vm0, %v1754_v45, %v1565_v28  ;;  %v1571_v37 = vunpack.i.h.bf16 %v1569_v31  ;;  %v1570_v38 = vunpack.i.l.bf16 %v1569_v31 }
  0xa2   : > { %v1574_v39 = vpop.permute.xlu0 %1573  ;;  %1445 = vmatprep.subr.bf16.mxu0 %v1444_v33 }
  0xa3   : > { %v472_v40 = vsel %vm465_vm2, %v463_v36, %v1570_v38  ;;  %v473_v41 = vsel %vm465_vm2, %v464_v35, %v1571_v37  ;;  %v1576_v42 = vunpack.i.h.bf16 %v1574_v39  ;;  %v1575_v43 = vunpack.i.l.bf16 %v1574_v39  ;;  %1447 = vmatpush3.bf16.msra.mxu0 %v1444_v33 }
  0xa4   : > { %v1579_v44 = vpop.permute.xlu1 %1578 }
  0xa5   : > { %v481_v47 = vsel %vm474_vm3, %v472_v40, %v1575_v43  ;;  %v482_v48 = vsel %vm474_vm3, %v473_v41, %v1576_v42  ;;  %v1581_v46 = vunpack.i.h.bf16 %v1579_v44  ;;  %v1580_v49 = vunpack.i.l.bf16 %v1579_v44 }
  0xa7   : > { %v490_v45 = vsel %vm483_vm1, %v481_v47, %v1580_v49  ;;  %v491_v50 = vsel %vm483_vm1, %v482_v48, %v1581_v46 }
  0xa8   : > { %v1448_v51 = vpack.c.bf16 %v491_v50, %v490_v45 }
  0xaa   : > { %1449 = vmatprep.subr.bf16.mxu0 %v1448_v51 }
  0xab   : > { %1451 = vmatpush3.bf16.msra.mxu0 %v1448_v51 }
  0xae   : > { %1393 = vmatmul.mubr.msk.f32.vlgmr.msra.gmra.mrb[0].mxu0 %vm483_vm1, %v493_v52 }
  0xaf   : > { %1395 = vmatprep.mubr.msk.f32.mxu0 %vm483_vm1, %v494_v2 }
  0xb2   : > { %1396 = vmatmul.mubr.msk.f32.gmra.mrb[2].mxu0 %vm483_vm1, %v495_v53 }
  0xb3   : > { %1398 = vmatprep.mubr.msk.f32.mxu0 %vm483_vm1, %v496_v54 }
  0xb6   : > { %1399 = vmatmul.mubr.msk.f32.gmra.mrb[4].mxu0 %vm483_vm1, %v497_v4 }
  0xb7   : > { %1401 = vmatprep.mubr.msk.f32.mxu0 %vm483_vm1, %v498_v55 }
  0xba   : > { %1402 = vmatmul.mubr.msk.f32.gmra.mrb[6].mxu0 %vm483_vm1, %v499_v56 }
 0x181   : > { %v1394_v57 = vpop.f32.mrb[0].mxu0 }
 0x182   : > { %v590_v14 = vpop.f32.mrb[1].mxu0 }
 0x183   : > { %1424 = vmatprep.mubr.msk.f32.mxu1 %vm639_vm4, %v590_v14 }
 0x184   : > { %1425 = vmatmul.mubr.msk.f32.vlgmr.msra.gmra.mrb[0].mxu1 %vm639_vm4, %v1394_v57 }
 0x185   : > { %v1397_v58 = vpop.f32.mrb[2].mxu0 }
 0x186   : > { %v600_v15 = vpop.f32.mrb[3].mxu0 }
 0x187   : > { %1427 = vmatprep.mubr.msk.f32.mxu1 %vm639_vm4, %v600_v15 }
 0x188   : > { %1428 = vmatmul.mubr.msk.f32.gmra.mrb[2].mxu1 %vm639_vm4, %v1397_v58 }
 0x189   : > { %v1400_v59 = vpop.f32.mrb[4].mxu0 }
 0x18a   : > { %v610_v60 = vpop.f32.mrb[5].mxu0 }
 0x18b   : > { %1430 = vmatprep.mubr.msk.f32.mxu1 %vm639_vm4, %v610_v60 }
 0x18c   : > { %1431 = vmatmul.mubr.msk.f32.gmra.mrb[4].mxu1 %vm639_vm4, %v1400_v59 }
 0x18d   : > { %v1403_v61 = vpop.f32.mrb[6].mxu0 }
 0x18e   : > { %v620_v62 = vpop.f32.mrb[7].mxu0 }
 0x18f   : > { %1433 = vmatprep.mubr.msk.f32.mxu1 %vm639_vm4, %v620_v62 }
 0x190   : > { %1434 = vmatmul.mubr.msk.f32.gmra.mrb[6].mxu1 %vm639_vm4, %v1403_v61 }
 0x257   : > { %v1902_v63 = vpop.f32.mrb[0].mxu1 }
 0x258   : > { %787 = vrot.lane.b32.xlu1 %v1902_v63, %s1626_s13  ;;  %v1906_v0 = vpop.f32.mrb[1].mxu1  ;;  %v1912_v1 = vmul.f32 %v1902_v63, %v1902_v63 }
 0x259   : > { %785 = vrot.lane.b32.xlu0 %v1906_v0, %s1626_s13  ;;  %v1918_v5 = vmul.f32 %v1906_v0, %v1906_v0 }
 0x25b   : > { %v1914_v3 = vpop.f32.mrb[2].mxu1 }
 0x25c   : > { %827 = vrot.lane.b32.xlu1 %v1912_v1, %s1625_s12  ;;  %v1922_v6 = vpop.f32.mrb[3].mxu1  ;;  %v1926_v7 = vmul.f32 %v1914_v3, %v1914_v3 }
 0x25d   : > { %825 = vrot.lane.b32.xlu0 %v1918_v5, %s1625_s12  ;;  %v1932_v8 = vmul.f32 %v1922_v6, %v1922_v6 }
 0x25f   : > { %v1934_v9 = vpop.f32.mrb[4].mxu1 }
 0x260   : > { %831 = vrot.lane.b32.xlu1 %v1926_v7, %s1625_s12  ;;  %v1938_v10 = vpop.f32.mrb[5].mxu1  ;;  %v1942_v11 = vmul.f32 %v1934_v9, %v1934_v9 }
 0x261   : > { %829 = vrot.lane.b32.xlu0 %v1932_v8, %s1625_s12  ;;  %v1948_v12 = vmul.f32 %v1938_v10, %v1938_v10 }
 0x263   : > { %v1950_v13 = vpop.f32.mrb[6].mxu1 }
 0x264   : > { %835 = vrot.lane.b32.xlu1 %v1942_v11, %s1625_s12  ;;  %v1954_v16 = vpop.f32.mrb[7].mxu1  ;;  %v1958_v17 = vmul.f32 %v1950_v13, %v1950_v13 }
 0x265   : > { %833 = vrot.lane.b32.xlu0 %v1948_v12, %s1625_s12  ;;  %v1964_v18 = vmul.f32 %v1954_v16, %v1954_v16 }
 0x268   : > { %839 = vrot.lane.b32.xlu1 %v1958_v17, %s1625_s12 }
 0x269   : > { %837 = vrot.lane.b32.xlu0 %v1964_v18, %s1625_s12  ;;  %s1627_s12 = smov 96  }
 0x26c   : > { %791 = vrot.lane.b32.xlu1 %v1914_v3, %s1626_s13 }
 0x26d   : > { %789 = vrot.lane.b32.xlu0 %v1922_v6, %s1626_s13 }
 0x270   : > { %795 = vrot.lane.b32.xlu1 %v1934_v9, %s1626_s13 }
 0x271   : > { %793 = vrot.lane.b32.xlu0 %v1938_v10, %s1626_s13 }
 0x274   : > { %799 = vrot.lane.b32.xlu1 %v1950_v13, %s1626_s13 }
 0x275   : > { %797 = vrot.lane.b32.xlu0 %v1954_v16, %s1626_s13 }
 0x2ca   : > { %v788_v19 = vpop.permute.xlu1 %787 }
 0x2cb   : > { %v1983_v20 = vmul.f32 %v1902_v63, %v788_v19  ;;  %v786_v21 = vpop.permute.xlu0 %785 }
 0x2cc   : > { %v1986_v22 = vmul.f32 %v786_v21, %v1906_v0 }
 0x2cd   : > { %867 = vrot.lane.b32.xlu1 %v1983_v20, %s1624_s11 }
 0x2ce   : > { %v828_v23 = vpop.permute.xlu1 %827  ;;  %865 = vrot.lane.b32.xlu0 %v1986_v22, %s1624_s11 }
 0x2cf   : > { %v850_v24 = vsub.f32 %v1902_v63, %v828_v23  ;;  %v826_v25 = vpop.permute.xlu0 %825 }
 0x2d0   : > { %v849_v34 = vsub.f32 %v1906_v0, %v826_v25 }
 0x2d1   : > { %1019 = vrot.lane.b32.xlu1 %v850_v24, %s1626_s13 }
 0x2d2   : > { %v832_v26 = vpop.permute.xlu1 %831  ;;  %1017 = vrot.lane.b32.xlu0 %v849_v34, %s1626_s13 }
 0x2d3   : > { %v852_v32 = vsub.f32 %v1914_v3, %v832_v26  ;;  %v830_v27 = vpop.permute.xlu0 %829 }
 0x2d4   : > { %v851_v28 = vsub.f32 %v1922_v6, %v830_v27 }
 0x2d5   : > { %1023 = vrot.lane.b32.xlu1 %v852_v32, %s1626_s13 }
 0x2d6   : > { %v836_v29 = vpop.permute.xlu1 %835  ;;  %1021 = vrot.lane.b32.xlu0 %v851_v28, %s1626_s13 }
 0x2d7   : > { %v2001_v30 = vsub.f32 %v1934_v9, %v836_v29  ;;  %v834_v31 = vpop.permute.xlu0 %833 }
 0x2d8   : > { %v2004_v33 = vsub.f32 %v1938_v10, %v834_v31 }
 0x2d9   : > { %1027 = vrot.lane.b32.xlu1 %v2001_v30, %s1626_s13 }
 0x2da   : > { %v840_v35 = vpop.permute.xlu1 %839  ;;  %1025 = vrot.lane.b32.xlu0 %v2004_v33, %s1626_s13 }
 0x2db   : > { %v2011_v36 = vsub.f32 %v1950_v13, %v840_v35  ;;  %v838_v37 = vpop.permute.xlu0 %837 }
 0x2dc   : > { %v2014_v38 = vsub.f32 %v1954_v16, %v838_v37 }
 0x2dd   : > { %1031 = vrot.lane.b32.xlu1 %v2011_v36, %s1626_s13 }
 0x2de   : > { %v792_v39 = vpop.permute.xlu1 %791  ;;  %1029 = vrot.lane.b32.xlu0 %v2014_v38, %s1626_s13 }
 0x2df   : > { %v2021_v40 = vmul.f32 %v1914_v3, %v792_v39  ;;  %v790_v41 = vpop.permute.xlu0 %789 }
 0x2e0   : > { %v2024_v42 = vmul.f32 %v790_v41, %v1922_v6 }
 0x2e1   : > { %871 = vrot.lane.b32.xlu1 %v2021_v40, %s1624_s11 }
 0x2e2   : > { %v796_v43 = vpop.permute.xlu1 %795  ;;  %869 = vrot.lane.b32.xlu0 %v2024_v42, %s1624_s11 }
 0x2e3   : > { %v2031_v44 = vmul.f32 %v1934_v9, %v796_v43  ;;  %v794_v47 = vpop.permute.xlu0 %793 }
 0x2e4   : > { %v2034_v48 = vmul.f32 %v794_v47, %v1938_v10 }
 0x2e5   : > { %875 = vrot.lane.b32.xlu1 %v2031_v44, %s1624_s11 }
 0x2e6   : > { %v800_v46 = vpop.permute.xlu1 %799  ;;  %873 = vrot.lane.b32.xlu0 %v2034_v48, %s1624_s11 }
 0x2e7   : > { %v2041_v49 = vmul.f32 %v1950_v13, %v800_v46  ;;  %v798_v45 = vpop.permute.xlu0 %797 }
 0x2e8   : > { %v2044_v50 = vmul.f32 %v798_v45, %v1954_v16 }
 0x2e9   : > { %879 = vrot.lane.b32.xlu1 %v2041_v49, %s1624_s11 }
 0x2ea   : > { %877 = vrot.lane.b32.xlu0 %v2044_v50, %s1624_s11 }
 0x2ed   : > { %971 = vrot.lane.b32.xlu1 %v1912_v1, %s1626_s13 }
 0x2ee   : > { %969 = vrot.lane.b32.xlu0 %v1918_v5, %s1626_s13 }
 0x2f1   : > { %975 = vrot.lane.b32.xlu1 %v1926_v7, %s1626_s13 }
 0x2f2   : > { %973 = vrot.lane.b32.xlu0 %v1932_v8, %s1626_s13 }
 0x2f5   : > { %979 = vrot.lane.b32.xlu1 %v1942_v11, %s1626_s13 }
 0x2f6   : > { %977 = vrot.lane.b32.xlu0 %v1948_v12, %s1626_s13 }
 0x2f9   : > { %983 = vrot.lane.b32.xlu1 %v1958_v17, %s1626_s13 }
 0x2fa   : > { %981 = vrot.lane.b32.xlu0 %v1964_v18, %s1626_s13 }
 0x33f   : > { %v868_v51 = vpop.permute.xlu1 %867 }
 0x340   : > { %v866_v52 = vpop.permute.xlu0 %865  ;;  %v890_v2 = vsub.f32 %v1902_v63, %v868_v51 }
 0x341   : > { %v889_v53 = vsub.f32 %v1906_v0, %v866_v52 }
 0x342   : > { %v914_v57 = vmul.f32 2.0, %v890_v2 }
 0x343   : > { %v1020_v54 = vpop.permute.xlu1 %1019  ;;  %v913_v58 = vmul.f32 2.0, %v889_v53 }
 0x344   : > { %v1042_v4 = vadd.f32 %v1020_v54, %v850_v24  ;;  %v1018_v55 = vpop.permute.xlu0 %1017  ;;  %v922_v61 = vadd.f32 0.0009, %v914_v57 }
 0x345   : > { %v1041_v56 = vadd.f32 %v1018_v55, %v849_v34  ;;  %v921_v63 = vadd.f32 0.0009, %v913_v58 }
 0x346   : > { %v1050_v14 = vadd.f32 0.0009, %v1042_v4 }
 0x347   : > { %v1049_v15 = vadd.f32 0.0009, %v1041_v56  ;;  %v1024_v59 = vpop.permute.xlu1 %1023 }
 0x348   : > { %1067 = vrot.lane.b32.xlu1 %v1050_v14, %s1627_s12  ;;  %v1022_v60 = vpop.permute.xlu0 %1021  ;;  %v1044_v62 = vadd.f32 %v1024_v59, %v852_v32 }
 0x349   : > { %1065 = vrot.lane.b32.xlu0 %v1049_v15, %s1627_s12  ;;  %v1043_v19 = vadd.f32 %v1022_v60, %v851_v28 }
 0x34a   : > { %v1052_v23 = vadd.f32 0.0009, %v1044_v62 }
 0x34b   : > { %v1028_v0 = vpop.permute.xlu1 %1027  ;;  %v1051_v25 = vadd.f32 0.0009, %v1043_v19 }
 0x34c   : > { %939 = vrot.lane.b32.xlu1 %v922_v61, %s1624_s11  ;;  %v1026_v21 = vpop.permute.xlu0 %1025  ;;  %v1046_v24 = vadd.f32 %v1028_v0, %v2001_v30 }
 0x34d   : > { %937 = vrot.lane.b32.xlu0 %v921_v63, %s1624_s11  ;;  %v1045_v34 = vadd.f32 %v1026_v21, %v2004_v33 }
 0x34e   : > { %v1054_v32 = vadd.f32 0.0009, %v1046_v24 }
 0x34f   : > { %v1032_v26 = vpop.permute.xlu1 %1031  ;;  %v1053_v29 = vadd.f32 0.0009, %v1045_v34 }
 0x350   : > { %1071 = vrot.lane.b32.xlu1 %v1052_v23, %s1627_s12  ;;  %v1030_v27 = vpop.permute.xlu0 %1029  ;;  %v1048_v28 = vadd.f32 %v1032_v26, %v2011_v36 }
 0x351   : > { %1069 = vrot.lane.b32.xlu0 %v1051_v25, %s1627_s12  ;;  %v1047_v31 = vadd.f32 %v1030_v27, %v2014_v38 }
 0x352   : > { %v1056_v39 = vadd.f32 0.0009, %v1048_v28 }
 0x353   : > { %v872_v35 = vpop.permute.xlu1 %871  ;;  %v1055_v43 = vadd.f32 0.0009, %v1047_v31 }
 0x354   : > { %v892_v37 = vsub.f32 %v1914_v3, %v872_v35  ;;  %1075 = vrot.lane.b32.xlu1 %v1054_v32, %s1627_s12  ;;  %v870_v30 = vpop.permute.xlu0 %869 }
 0x355   : > { %v891_v33 = vsub.f32 %v1922_v6, %v870_v30  ;;  %1073 = vrot.lane.b32.xlu0 %v1053_v29, %s1627_s12 }
 0x356   : > { %v916_v41 = vmul.f32 2.0, %v892_v37 }
 0x357   : > { %v915_v47 = vmul.f32 2.0, %v891_v33  ;;  %v876_v46 = vpop.permute.xlu1 %875 }
 0x358   : > { %v894_v36 = vsub.f32 %v1934_v9, %v876_v46  ;;  %1079 = vrot.lane.b32.xlu1 %v1056_v39, %s1627_s12  ;;  %v874_v38 = vpop.permute.xlu0 %873  ;;  %v924_v3 = vadd.f32 0.0009, %v916_v41 }
 0x359   : > { %v893_v45 = vsub.f32 %v1938_v10, %v874_v38  ;;  %1077 = vrot.lane.b32.xlu0 %v1055_v43, %s1627_s12  ;;  %v923_v52 = vadd.f32 0.0009, %v915_v47 }
 0x35a   : > { %v918_v51 = vmul.f32 2.0, %v894_v36 }
 0x35b   : > { %v917_v6 = vmul.f32 2.0, %v893_v45  ;;  %v880_v2 = vpop.permute.xlu1 %879 }
 0x35c   : > { %v896_v53 = vsub.f32 %v1950_v13, %v880_v2  ;;  %943 = vrot.lane.b32.xlu1 %v924_v3, %s1624_s11  ;;  %v878_v54 = vpop.permute.xlu0 %877  ;;  %v926_v9 = vadd.f32 0.0009, %v918_v51  ;;  %v899_v2 = vmul.f32 2.0, %v2024_v42 }
 0x35d   : > { %v895_v4 = vsub.f32 %v1954_v16, %v878_v54  ;;  %941 = vrot.lane.b32.xlu0 %v923_v52, %s1624_s11  ;;  %v925_v56 = vadd.f32 0.0009, %v917_v6 }
 0x35e   : > { %v920_v55 = vmul.f32 2.0, %v896_v53  ;;  %v907_v42 = vadd.f32 0.0001, %v899_v2 }
 0x35f   : > { %v919_v10 = vmul.f32 2.0, %v895_v4  ;;  %v972_v13 = vpop.permute.xlu1 %971 }
 0x360   : > { %947 = vrot.lane.b32.xlu1 %v926_v9, %s1624_s11  ;;  %v928_v57 = vadd.f32 0.0009, %v920_v55  ;;  %v970_v58 = vpop.permute.xlu0 %969  ;;  %v994_v61 = vadd.f32 %v972_v13, %v1912_v1  ;;  %v898_v1 = vmul.f32 2.0, %v1983_v20 }
 0x361   : > { %945 = vrot.lane.b32.xlu0 %v925_v56, %s1624_s11  ;;  %v927_v14 = vadd.f32 0.0009, %v919_v10  ;;  %v993_v62 = vadd.f32 %v970_v58, %v1918_v5  ;;  %v897_v5 = vmul.f32 2.0, %v1986_v22  ;;  %v902_v56 = vmul.f32 2.0, %v2031_v44 }
 0x362   : > { %v1002_v0 = vadd.f32 0.0001, %v994_v61  ;;  %v906_v39 = vadd.f32 0.0001, %v898_v1  ;;  %v903_v44 = vmul.f32 2.0, %v2044_v50 }
 0x363   : > { %v976_v15 = vpop.permute.xlu1 %975  ;;  %v1001_v21 = vadd.f32 0.0001, %v993_v62  ;;  %v905_v47 = vadd.f32 0.0001, %v897_v5  ;;  %v910_v61 = vadd.f32 0.0001, %v902_v56 }
 0x364   : > { %951 = vrot.lane.b32.xlu1 %v928_v57, %s1624_s11  ;;  %v974_v16 = vpop.permute.xlu0 %973  ;;  %v996_v26 = vadd.f32 %v976_v15, %v1926_v7 }
 0x365   : > { %949 = vrot.lane.b32.xlu0 %v927_v14, %s1624_s11  ;;  %v995_v27 = vadd.f32 %v974_v16, %v1932_v8 }
 0x366   : > { %v1004_v29 = vadd.f32 0.0001, %v996_v26  ;;  %v911_v26 = vadd.f32 0.0001, %v903_v44 }
 0x367   : > { %v980_v59 = vpop.permute.xlu1 %979  ;;  %v1003_v35 = vadd.f32 0.0001, %v995_v27 }
 0x368   : > { %v978_v60 = vpop.permute.xlu0 %977  ;;  %v998_v31 = vadd.f32 %v980_v59, %v1942_v11  ;;  %v904_v59 = vmul.f32 2.0, %v2041_v49 }
 0x369   : > { %v997_v37 = vadd.f32 %v978_v60, %v1948_v12 }
 0x36a   : > { %v1006_v8 = vadd.f32 0.0001, %v998_v31 }
 0x36b   : > { %v984_v63 = vpop.permute.xlu1 %983  ;;  %v1005_v20 = vadd.f32 0.0001, %v997_v37 }
 0x36c   : > { %v982_v19 = vpop.permute.xlu0 %981  ;;  %v1000_v43 = vadd.f32 %v984_v63, %v1958_v17 }
 0x36d   : > { %v999_v22 = vadd.f32 %v982_v19, %v1964_v18  ;;  %v900_v18 = vmul.f32 2.0, %v2021_v40  ;;  %v901_v40 = vmul.f32 2.0, %v2034_v48 }
 0x36e   : > { %v1008_v52 = vadd.f32 0.0001, %v1000_v43 }
 0x36f   : > { %v1007_v53 = vadd.f32 0.0001, %v999_v22  ;;  %v908_v10 = vadd.f32 0.0001, %v900_v18  ;;  %v909_v48 = vadd.f32 0.0001, %v901_v40 }
 0x3ba   : > { %v1068_v23 = vpop.permute.xlu1 %1067 }
 0x3bb   : > { %v1090_v24 = vmul.f32 %v1068_v23, %v1002_v0  ;;  %v1066_v25 = vpop.permute.xlu0 %1065 }
 0x3bc   : > { %v1089_v34 = vmul.f32 %v1066_v25, %v1001_v21  ;;  %v912_v25 = vadd.f32 0.0001, %v904_v59 }
 0x3bd   : > { %1582 = vrcp.f32 %v1090_v24 }
 0x3be   : > { %1584 = vrcp.f32 %v1089_v34  ;;  %v940_v32 = vpop.permute.xlu1 %939 }
 0x3bf   : > { %v938_v28 = vpop.permute.xlu0 %937  ;;  %v962_v46 = vmul.f32 %v940_v32, %v906_v39 }
 0x3c0   : > { %v961_v12 = vmul.f32 %v938_v28, %v905_v47 }
 0x3c2   : > { %v1072_v30 = vpop.permute.xlu1 %1071 }
 0x3c3   : > { %v1092_v33 = vmul.f32 %v1072_v30, %v1004_v29  ;;  %v1070_v7 = vpop.permute.xlu0 %1069 }
 0x3c4   : > { %v1091_v41 = vmul.f32 %v1070_v7, %v1003_v35 }
 0x3c5   : > { %1586 = vrcp.f32 %v1092_v33 }
 0x3c6   : > { %1588 = vrcp.f32 %v1091_v41  ;;  %v1076_v11 = vpop.permute.xlu1 %1075 }
 0x3c7   : > { %v1583_v36 = vpop.eup %1582  ;;  %v1094_v38 = vmul.f32 %v1076_v11, %v1006_v8  ;;  %v1074_v17 = vpop.permute.xlu0 %1073 }
 0x3c8   : > { %v1585_v45 = vpop.eup %1584  ;;  %v1106_v3 = vmul.f32 %v1583_v36, %v962_v46  ;;  %v1093_v51 = vmul.f32 %v1074_v17, %v1005_v20 }
 0x3c9   : > { %v1105_v6 = vmul.f32 %v1585_v45, %v961_v12  ;;  %1590 = vrcp.f32 %v1094_v38 }
 0x3ca   : > { %1142 = vst.msk [vmem:[%s2109_s15 + $0x8] sm:$0xff] %vm456_vm0, %v1106_v3  ;;  %1592 = vrcp.f32 %v1093_v51  ;;  %v1080_v54 = vpop.permute.xlu1 %1079 }
 0x3cb   : > { %1141 = vst.msk [vmem:[%s2109_s15] sm:$0xff] %vm456_vm0, %v1105_v6  ;;  %v1096_v4 = vmul.f32 %v1080_v54, %v1008_v52  ;;  %v1078_v9 = vpop.permute.xlu0 %1077 }
 0x3cc   : > { %v1095_v55 = vmul.f32 %v1078_v9, %v1007_v53 }
 0x3cd   : > { %1594 = vrcp.f32 %v1096_v4 }
 0x3ce   : > { %1596 = vrcp.f32 %v1095_v55  ;;  %v944_v57 = vpop.permute.xlu1 %943 }
 0x3cf   : > { %v1587_v14 = vpop.eup %1586  ;;  %v964_v13 = vmul.f32 %v944_v57, %v908_v10  ;;  %v942_v58 = vpop.permute.xlu0 %941 }
 0x3d0   : > { %v1589_v15 = vpop.eup %1588  ;;  %v963_v16 = vmul.f32 %v942_v58, %v907_v42 }
 0x3d1   : > { %v1108_v60 = vmul.f32 %v1587_v14, %v964_v13 }
 0x3d2   : > { %v1107_v62 = vmul.f32 %v1589_v15, %v963_v16  ;;  %v948_v63 = vpop.permute.xlu1 %947 }
 0x3d3   : > { %v1591_v19 = vpop.eup %1590  ;;  %1144 = vst.msk [vmem:[%s2109_s15 + $0x18] sm:$0xff] %vm456_vm0, %v1108_v60  ;;  %v966_v0 = vmul.f32 %v948_v63, %v910_v61  ;;  %v946_v21 = vpop.permute.xlu0 %945 }
 0x3d4   : > { %v1593_v23 = vpop.eup %1592  ;;  %1143 = vst.msk [vmem:[%s2109_s15 + $0x10] sm:$0xff] %vm456_vm0, %v1107_v62  ;;  %v965_v24 = vmul.f32 %v946_v21, %v909_v48 }
 0x3d5   : > { %v1110_v49 = vmul.f32 %v1591_v19, %v966_v0 }
 0x3d6   : > { %v1109_v34 = vmul.f32 %v1593_v23, %v965_v24  ;;  %v952_v50 = vpop.permute.xlu1 %951 }
 0x3d7   : > { %v1595_v27 = vpop.eup %1594  ;;  %1146 = vst.msk [vmem:[%s2109_s15 + $0x28] sm:$0xff] %vm456_vm0, %v1110_v49  ;;  %v968_v32 = vmul.f32 %v952_v50, %v912_v25  ;;  %v950_v28 = vpop.permute.xlu0 %949 }
 0x3d8   : > { %v1597_v1 = vpop.eup %1596  ;;  %1145 = vst.msk [vmem:[%s2109_s15 + $0x20] sm:$0xff] %vm456_vm0, %v1109_v34  ;;  %v967_v5 = vmul.f32 %v950_v28, %v911_v26 }
 0x3d9   : > { %v1112_v29 = vmul.f32 %v1595_v27, %v968_v32 }
 0x3da   : > { %v1111_v31 = vmul.f32 %v1597_v1, %v967_v5 }
 0x3db   : > { %1148 = vst.msk [vmem:[%s2109_s15 + $0x38] sm:$0xff] %vm456_vm0, %v1112_v29 }
 0x3dc   : > { %1147 = vst.msk [vmem:[%s2109_s15 + $0x30] sm:$0xff] %vm456_vm0, %v1111_v31 }
 0x3dd PF: > { %s16_s20 = sadd.s32 1, %s1620_s20   ;;  %s2148_s18 = smov %s1616_s19 }
 0x3de   : > { %p13_p6 = scmp.ge.s32.totalorder %s16_s20, 4   ;;  %s2149_s19 = smov %s2151_s21 }
 0x3e0   :  { %15 = sbr.rel (!%p13_p6) target bundleno = 2 (0x2), region = 89 }

</bundles_post_ra>
